<compile_context>
chip_gen: v6e
topology: v6e:2x2x1
jax: 0.10.0
libtpu: 0.0.40
codegen_flags: <defaults>
</compile_context>

<pallas_src>
import functools

import jax
import jax.numpy as jnp
from jax import lax
from jax.experimental import pallas as pl
from jax.experimental.pallas import tpu as pltpu

# TODO(synk): PIQN (EntityAwareBert encoder), SeqDecoder (beam search) and the
#             PIQN/Consistency/Seq2Seq losses are pretrained black boxes with no
#             checkpoint here; their outputs (h_token, project_triple) are
#             synthesized deterministically below and only the SetPred4RE-owned
#             mask-expand + cross-attention + gated-mix fusion is a kernel.


def _fused_attn_gate_kernel(tri_ref, enc_ref, mask_ref, wq_ref, wkv_ref,
                            bq_ref, bkv_ref, gate_ref, o_ref, acc_ref,
                            *, bc, t_rows, s_rows, d_model, num_heads, head_dim):
    """Fused CPTAttention (no out_proj) + gated residual mix for one batch block.

    tri_ref  : (bc*T, D)   project_triple rows of the block (queries + residual)
    enc_ref  : (bc*S, D)   h_token rows of the block (keys / values)
    mask_ref : (1, bc, S)  raw padding mask (1 keep / 0 pad) -- no dense bias DMA
    wq_ref   : (D, D)      Wq * head_dim**-0.5      (scale folded in wrapper)
    wkv_ref  : (D, 2D)     [Wk | Wv * (1 - gate)]   ((1-gate) folded in wrapper)
    bq_ref   : (1, D), bkv_ref : (1, 2D)             matching fused biases
    gate_ref : (1, 1)      gate scalar in SMEM
    acc_ref  : (bc*T, D)   VMEM scratch accumulator for per-head context
    """
    D = d_model
    f32 = jnp.float32

    x = tri_ref[...]                                        # (bc*T, D) residual / queries

    # Two MXU pushes for the whole batch block (Q, then fused K|V).
    q = jnp.dot(x, wq_ref[...], preferred_element_type=f32) + bq_ref[...]
    kv = jnp.dot(enc_ref[...], wkv_ref[...],
                 preferred_element_type=f32) + bkv_ref[...]  # (bc*S, 2D)

    # _expand_mask rebuilt in-kernel from the raw padding mask: additive 0/-1e9
    # bias.  Finite constant (vs finfo.min) keeps a fully-padded row NaN-free.
    bias = (mask_ref[0] - 1.0) * jnp.float32(1e9)            # (bc, S)

    g = gate_ref[0, 0]

    # bc (<=2) and num_heads (4) are tiny here, so static Python loops are fine.
    # TODO(synk): at CPT production dims (d_model=1024, H=16, hd=64) switch the
    #             head loop to lax.fori_loop(..., unroll=...) or a head-batched
    #             contraction so the MXU contraction dim is not 64-of-256 idle.
    for b in range(bc):
        q_rows = slice(b * t_rows, (b + 1) * t_rows)
        kv_rows = slice(b * s_rows, (b + 1) * s_rows)
        bias_b = bias[b:b + 1, :]                            # (1, S) broadcast over queries
        for h in range(num_heads):
            lo = h * head_dim
            hi = lo + head_dim
            qh = q[q_rows, lo:hi]                            # (T, hd), already *scale
            kh = kv[kv_rows, lo:hi]                          # (S, hd)
            vh = kv[kv_rows, D + lo:D + hi]                  # (S, hd), already *(1-gate)
            sc = lax.dot_general(qh, kh, (((1,), (1,)), ((), ())),
                                 preferred_element_type=f32)  # (T, S)
            sc = sc + bias_b
            sc_max = jnp.max(sc, axis=-1, keepdims=True)
            p = jnp.exp(sc - sc_max)
            denom = jnp.sum(p, axis=-1, keepdims=True)
            p = p * pl.reciprocal(denom, approx=True)        # EUP slot, not VPU divide
            acc_ref[q_rows, lo:hi] = jnp.dot(p, vh, preferred_element_type=f32)

    # gate * project_triple + (1-gate) * attn   ((1-gate) already folded into v)
    # Single full-block store.
    o_ref[...] = g * x + acc_ref[...]


@functools.partial(jax.jit, static_argnames=("num_heads", "num_batch_blocks"))
def triples_attn_to_context(project_triple, encoder_output, attention_mask,
                            wq, wk, wv, bq, bk, bv, gate,
                            *, num_heads, num_batch_blocks=1):
    """state.project_triple = gate*project_triple + (1-gate)*CPTAttention(...)."""
    B, T, D = project_triple.shape
    S = encoder_output.shape[1]
    assert D % num_heads == 0
    head_dim = D // num_heads
    nb = num_batch_blocks
    assert B % nb == 0, "batch must divide num_batch_blocks"
    Bc = B // nb

    f32 = jnp.float32

    # ---- weight-side constant folds (scale into Wq/bq, (1-gate) into Wv/bv) ----
    scale = jnp.float32(head_dim ** -0.5)
    one_m_gate = (1.0 - gate).astype(f32)
    w_q = (wq * scale).astype(f32)                                      # (D, D)
    b_q = (bq * scale).reshape(1, D).astype(f32)
    w_kv = jnp.concatenate([wk, wv * one_m_gate], axis=1).astype(f32)   # (D, 2D)
    b_kv = jnp.concatenate([bk, bv * one_m_gate]).reshape(1, 2 * D).astype(f32)

    # ---- free contiguous leading-dim collapses; NO activation concat, NO dense bias ----
    tri_rows = project_triple.astype(f32).reshape(B * T, D)
    enc_rows = encoder_output.astype(f32).reshape(B * S, D)
    mask = attention_mask.astype(f32).reshape(nb, Bc, S)    # raw padding mask only

    gate_arr = jnp.reshape(gate, (1, 1)).astype(f32)

    kernel = functools.partial(_fused_attn_gate_kernel,
                               bc=Bc, t_rows=T, s_rows=S, d_model=D,
                               num_heads=num_heads, head_dim=head_dim)

    # Explicit scoped-VMEM budget: double-buffered in/out blocks + scratch, with
    # generous headroom, clamped to v7x's 64 MiB physical VMEM.
    blk_bytes = 4 * (Bc * T * D + Bc * S * D + Bc * S
                     + D * D + 2 * D * D + 3 * D + 2 * Bc * T * D)
    vmem_limit = int(min(max(8 * blk_bytes, 16 << 20), 64 << 20))

    out = pl.pallas_call(
        kernel,
        out_shape=jax.ShapeDtypeStruct((B * T, D), f32),
        grid=(nb,),
        in_specs=[
            pl.BlockSpec((Bc * T, D), lambda c: (c, 0)),            # query/residual rows
            pl.BlockSpec((Bc * S, D), lambda c: (c, 0)),            # key/value rows
            pl.BlockSpec((1, Bc, S), lambda c: (c, 0, 0)),          # raw padding mask
            pl.BlockSpec((D, D), lambda c: (0, 0)),                 # Wq * scale
            pl.BlockSpec((D, 2 * D), lambda c: (0, 0)),             # [Wk | Wv*(1-g)]
            pl.BlockSpec((1, D), lambda c: (0, 0)),                 # bq * scale
            pl.BlockSpec((1, 2 * D), lambda c: (0, 0)),             # [bk | bv*(1-g)]
            pl.BlockSpec(memory_space=pltpu.MemorySpace.SMEM),      # gate scalar
        ],
        out_specs=pl.BlockSpec((Bc * T, D), lambda c: (c, 0)),
        scratch_shapes=[pltpu.VMEM((Bc * T, D), f32)],
        compiler_params=pltpu.CompilerParams(
            dimension_semantics=("parallel",),
            vmem_limit_bytes=vmem_limit),
    )(tri_rows, enc_rows, mask, w_q, w_kv, b_q, b_kv, gate_arr)

    return out.reshape(B, T, D).astype(project_triple.dtype)


def reference_forward(tri, enc, mask, wq, wk, wv, bq, bk, bv, gate, num_heads):
    """Pure-JAX reference of the same math (for correctness check)."""
    B, T, D = tri.shape
    S = enc.shape[1]
    hd = D // num_heads
    q = (tri @ wq + bq) * (hd ** -0.5)
    k = enc @ wk + bk
    v = enc @ wv + bv
    qh = q.reshape(B, T, num_heads, hd).transpose(0, 2, 1, 3)
    kh = k.reshape(B, S, num_heads, hd).transpose(0, 2, 1, 3)
    vh = v.reshape(B, S, num_heads, hd).transpose(0, 2, 1, 3)
    scores = jnp.einsum('bhtd,bhsd->bhts', qh, kh)
    bias = (1.0 - mask.astype(jnp.float32))[:, None, None, :] * jnp.finfo(jnp.float32).min
    probs = jax.nn.softmax(scores + bias, axis=-1)
    attn = jnp.einsum('bhts,bhsd->bhtd', probs, vh).transpose(0, 2, 1, 3).reshape(B, T, D)
    return gate * tri + (1.0 - gate) * attn


if __name__ == "__main__":
    # Shapes consistent with the forward:
    #   B=2 batch, T=8 generated triples (project_triple), S=16 tokens (h_token),
    #   D=32 model dim (d_model), H=4 decoder_attention_heads.
    B, T, S, D, H = 2, 8, 16, 32, 4

    key = jax.random.PRNGKey(0)
    keys = jax.random.split(key, 10)

    # Synthetic stand-ins for PIQN outputs (project_triple, h_token).
    project_triple = jax.random.normal(keys[0], (B, T, D), dtype=jnp.float32)
    encoder_output = jax.random.normal(keys[1], (B, S, D), dtype=jnp.float32)

    # attention_mask with padding (batchify builds 1s up to sent_len, 0s after).
    lengths = jnp.array([S, S - 4])
    attention_mask = (jnp.arange(S)[None, :] < lengths[:, None]).astype(jnp.float32)

    # CPTAttention parameters (q/k/v Linear with bias; do_out_proj=False).
    w_scale = 0.1
    wq = jax.random.normal(keys[2], (D, D), dtype=jnp.float32) * w_scale
    wk = jax.random.normal(keys[3], (D, D), dtype=jnp.float32) * w_scale
    wv = jax.random.normal(keys[4], (D, D), dtype=jnp.float32) * w_scale
    bq = jax.random.normal(keys[5], (D,), dtype=jnp.float32) * w_scale
    bk = jax.random.normal(keys[6], (D,), dtype=jnp.float32) * w_scale
    bv = jax.random.normal(keys[7], (D,), dtype=jnp.float32) * w_scale

    # self.gate = nn.Parameter(torch.tensor(0.5))
    gate = jnp.float32(0.5)

    ref = reference_forward(project_triple, encoder_output, attention_mask,
                            wq, wk, wv, bq, bk, bv, gate, H)

    # Fully collapsed grid: best on single-TC v5e / v6e.
    out = triples_attn_to_context(project_triple, encoder_output, attention_mask,
                                  wq, wk, wv, bq, bk, bv, gate,
                                  num_heads=H, num_batch_blocks=1)
    out = jax.block_until_ready(out)
    assert out.shape == (B, T, D)
    # Tolerance covers the EUP approximate-reciprocal softmax denominator.
    assert jnp.allclose(out, ref, atol=2e-3, rtol=2e-3), "mismatch vs JAX reference (nb=1)"

    # Two batch blocks: on v7x the 'parallel' grid axis gives one block per TensorCore.
    out2 = triples_attn_to_context(project_triple, encoder_output, attention_mask,
                                   wq, wk, wv, bq, bk, bv, gate,
                                   num_heads=H, num_batch_blocks=2)
    out2 = jax.block_until_ready(out2)
    assert jnp.allclose(out2, ref, atol=2e-3, rtol=2e-3), "mismatch vs JAX reference (nb=2)"

    print("KERNEL_OK")
</pallas_src>

<mosaic_0001>
module attributes {stable_mosaic.version = 11 : i64} {
  func.func @_fused_attn_gate_kernel(%arg0: i32, %arg1: memref<16x32xf32, #tpu.memory_space<vmem>>, %arg2: memref<32x32xf32, #tpu.memory_space<vmem>>, %arg3: memref<1x2x16xf32, #tpu.memory_space<vmem>>, %arg4: memref<32x32xf32, #tpu.memory_space<vmem>>, %arg5: memref<32x64xf32, #tpu.memory_space<vmem>>, %arg6: memref<1x32xf32, #tpu.memory_space<vmem>>, %arg7: memref<1x64xf32, #tpu.memory_space<vmem>>, %arg8: memref<1x1xf32, #tpu.memory_space<smem>>, %arg9: memref<16x32xf32, #tpu.memory_space<vmem>>, %arg10: memref<16x32xf32, #tpu.memory_space<vmem>>) attributes {dimension_semantics = [#tpu.dimension_semantics<parallel>], iteration_bounds = array<i64: 1>, scalar_prefetch = 0 : i64, scratch_operands = 1 : i64, tpu.core_type = #tpu.core_type<tc>, window_params = [{transform_indices = @transform_0, window_bounds = array<i64: 16, 32>}, {transform_indices = @transform_1, window_bounds = array<i64: 32, 32>}, {transform_indices = @transform_2, window_bounds = array<i64: 1, 2, 16>}, {pipeline_mode = #tpu.pipeline_mode<synchronous>, transform_indices = @transform_3, window_bounds = array<i64: 32, 32>}, {pipeline_mode = #tpu.pipeline_mode<synchronous>, transform_indices = @transform_4, window_bounds = array<i64: 32, 64>}, {pipeline_mode = #tpu.pipeline_mode<synchronous>, transform_indices = @transform_5, window_bounds = array<i64: 1, 32>}, {pipeline_mode = #tpu.pipeline_mode<synchronous>, transform_indices = @transform_6, window_bounds = array<i64: 1, 64>}, {transform_indices = @transform_7, window_bounds = array<i64: 1, 1>}, {transform_indices = @transform_8, window_bounds = array<i64: 16, 32>}]} {
    %c0 = arith.constant 0 : index
    %c0_0 = arith.constant 0 : index
    %0 = vector.load %arg1[%c0, %c0_0] : memref<16x32xf32, #tpu.memory_space<vmem>>, vector<16x32xf32>
    %c0_1 = arith.constant 0 : index
    %c0_2 = arith.constant 0 : index
    %1 = vector.load %arg4[%c0_1, %c0_2] : memref<32x32xf32, #tpu.memory_space<vmem>>, vector<32x32xf32>
    %cst = arith.constant dense<0.000000e+00> : vector<16x32xf32>
    %2 = tpu.matmul %0, %1, %cst {dimension_numbers = #tpu.dot_dimension_numbers<[1], [0], [0], [1], [0, 0, 1, 1], [], []>} : vector<16x32xf32>, vector<32x32xf32>, vector<16x32xf32> -> vector<16x32xf32>
    %c0_3 = arith.constant 0 : index
    %c0_4 = arith.constant 0 : index
    %3 = vector.load %arg6[%c0_3, %c0_4] : memref<1x32xf32, #tpu.memory_space<vmem>>, vector<1x32xf32>
    %4 = vector.broadcast %3 : vector<1x32xf32> to vector<16x32xf32>
    %5 = arith.addf %2, %4 : vector<16x32xf32>
    %c0_5 = arith.constant 0 : index
    %c0_6 = arith.constant 0 : index
    %6 = vector.load %arg2[%c0_5, %c0_6] : memref<32x32xf32, #tpu.memory_space<vmem>>, vector<32x32xf32>
    %c0_7 = arith.constant 0 : index
    %c0_8 = arith.constant 0 : index
    %7 = vector.load %arg5[%c0_7, %c0_8] : memref<32x64xf32, #tpu.memory_space<vmem>>, vector<32x64xf32>
    %cst_9 = arith.constant dense<0.000000e+00> : vector<32x64xf32>
    %8 = tpu.matmul %6, %7, %cst_9 {dimension_numbers = #tpu.dot_dimension_numbers<[1], [0], [0], [1], [0, 0, 1, 1], [], []>} : vector<32x32xf32>, vector<32x64xf32>, vector<32x64xf32> -> vector<32x64xf32>
    %c0_10 = arith.constant 0 : index
    %c0_11 = arith.constant 0 : index
    %9 = vector.load %arg7[%c0_10, %c0_11] : memref<1x64xf32, #tpu.memory_space<vmem>>, vector<1x64xf32>
    %10 = vector.broadcast %9 : vector<1x64xf32> to vector<32x64xf32>
    %11 = arith.addf %8, %10 : vector<32x64xf32>
    %c0_12 = arith.constant 0 : index
    %c0_13 = arith.constant 0 : index
    %c0_14 = arith.constant 0 : index
    %12 = vector.load %arg3[%c0_12, %c0_13, %c0_14] : memref<1x2x16xf32, #tpu.memory_space<vmem>>, vector<1x2x16xf32>
    %13 = vector.shape_cast %12 : vector<1x2x16xf32> to vector<2x16xf32>
    %cst_15 = arith.constant 1.000000e+00 : f32
    %14 = vector.broadcast %cst_15 : f32 to vector<2x16xf32>
    %15 = arith.subf %13, %14 : vector<2x16xf32>
    %cst_16 = arith.constant 1.000000e+09 : f32
    %16 = vector.broadcast %cst_16 : f32 to vector<2x16xf32>
    %17 = arith.mulf %15, %16 : vector<2x16xf32>
    %c0_17 = arith.constant 0 : index
    %c0_18 = arith.constant 0 : index
    %18 = memref.load %arg8[%c0_17, %c0_18] : memref<1x1xf32, #tpu.memory_space<smem>>
    %19 = vector.extract_strided_slice %17 {offsets = [0, 0], sizes = [1, 16], strides = [1, 1]} : vector<2x16xf32> to vector<1x16xf32>
    %20 = vector.extract_strided_slice %5 {offsets = [0, 0], sizes = [8, 8], strides = [1, 1]} : vector<16x32xf32> to vector<8x8xf32>
    %21 = vector.extract_strided_slice %11 {offsets = [0, 0], sizes = [16, 8], strides = [1, 1]} : vector<32x64xf32> to vector<16x8xf32>
    %22 = vector.extract_strided_slice %11 {offsets = [0, 32], sizes = [16, 8], strides = [1, 1]} : vector<32x64xf32> to vector<16x8xf32>
    %cst_19 = arith.constant dense<0.000000e+00> : vector<8x16xf32>
    %23 = tpu.matmul %20, %21, %cst_19 {dimension_numbers = #tpu.dot_dimension_numbers<[1], [1], [0], [0], [0, 0, 1, 0], [], []>} : vector<8x8xf32>, vector<16x8xf32>, vector<8x16xf32> -> vector<8x16xf32>
    %24 = vector.broadcast %19 : vector<1x16xf32> to vector<8x16xf32>
    %25 = arith.addf %23, %24 : vector<8x16xf32>
    %cst_20 = arith.constant dense<0xFF800000> : vector<8xf32>
    %26 = vector.multi_reduction <maximumf>, %25, %cst_20 [1] : vector<8x16xf32> to vector<8xf32>
    %27 = vector.shape_cast %26 : vector<8xf32> to vector<8x1xf32>
    %28 = vector.broadcast %27 : vector<8x1xf32> to vector<8x16xf32>
    %29 = arith.subf %25, %28 : vector<8x16xf32>
    %30 = math.exp %29 : vector<8x16xf32>
    %cst_21 = arith.constant dense<0.000000e+00> : vector<8xf32>
    %31 = vector.multi_reduction <add>, %30, %cst_21 [1] : vector<8x16xf32> to vector<8xf32>
    %32 = vector.shape_cast %31 : vector<8xf32> to vector<8x1xf32>
    %33 = tpu.reciprocal %32 {approx = true} : vector<8x1xf32> -> vector<8x1xf32>
    %34 = vector.broadcast %33 : vector<8x1xf32> to vector<8x16xf32>
    %35 = arith.mulf %30, %34 : vector<8x16xf32>
    %cst_22 = arith.constant dense<0.000000e+00> : vector<8x8xf32>
    %36 = tpu.matmul %35, %22, %cst_22 {dimension_numbers = #tpu.dot_dimension_numbers<[1], [0], [0], [1], [0, 0, 1, 1], [], []>} : vector<8x16xf32>, vector<16x8xf32>, vector<8x8xf32> -> vector<8x8xf32>
    %c0_23 = arith.constant 0 : index
    %c0_24 = arith.constant 0 : index
    %37 = vector.load %arg10[%c0_23, %c0_24] : memref<16x32xf32, #tpu.memory_space<vmem>>, vector<8x8xf32>
    tpu.vector_store %arg10[%c0_23, %c0_24], %36 {strides = array<i32>} : memref<16x32xf32, #tpu.memory_space<vmem>>, vector<8x8xf32>,
    %38 = vector.extract_strided_slice %5 {offsets = [0, 8], sizes = [8, 8], strides = [1, 1]} : vector<16x32xf32> to vector<8x8xf32>
    %39 = vector.extract_strided_slice %11 {offsets = [0, 8], sizes = [16, 8], strides = [1, 1]} : vector<32x64xf32> to vector<16x8xf32>
    %40 = vector.extract_strided_slice %11 {offsets = [0, 40], sizes = [16, 8], strides = [1, 1]} : vector<32x64xf32> to vector<16x8xf32>
    %cst_25 = arith.constant dense<0.000000e+00> : vector<8x16xf32>
    %41 = tpu.matmul %38, %39, %cst_25 {dimension_numbers = #tpu.dot_dimension_numbers<[1], [1], [0], [0], [0, 0, 1, 0], [], []>} : vector<8x8xf32>, vector<16x8xf32>, vector<8x16xf32> -> vector<8x16xf32>
    %42 = vector.broadcast %19 : vector<1x16xf32> to vector<8x16xf32>
    %43 = arith.addf %41, %42 : vector<8x16xf32>
    %cst_26 = arith.constant dense<0xFF800000> : vector<8xf32>
    %44 = vector.multi_reduction <maximumf>, %43, %cst_26 [1] : vector<8x16xf32> to vector<8xf32>
    %45 = vector.shape_cast %44 : vector<8xf32> to vector<8x1xf32>
    %46 = vector.broadcast %45 : vector<8x1xf32> to vector<8x16xf32>
    %47 = arith.subf %43, %46 : vector<8x16xf32>
    %48 = math.exp %47 : vector<8x16xf32>
    %cst_27 = arith.constant dense<0.000000e+00> : vector<8xf32>
    %49 = vector.multi_reduction <add>, %48, %cst_27 [1] : vector<8x16xf32> to vector<8xf32>
    %50 = vector.shape_cast %49 : vector<8xf32> to vector<8x1xf32>
    %51 = tpu.reciprocal %50 {approx = true} : vector<8x1xf32> -> vector<8x1xf32>
    %52 = vector.broadcast %51 : vector<8x1xf32> to vector<8x16xf32>
    %53 = arith.mulf %48, %52 : vector<8x16xf32>
    %cst_28 = arith.constant dense<0.000000e+00> : vector<8x8xf32>
    %54 = tpu.matmul %53, %40, %cst_28 {dimension_numbers = #tpu.dot_dimension_numbers<[1], [0], [0], [1], [0, 0, 1, 1], [], []>} : vector<8x16xf32>, vector<16x8xf32>, vector<8x8xf32> -> vector<8x8xf32>
    %c0_29 = arith.constant 0 : index
    %c8 = arith.constant 8 : index
    %55 = vector.load %arg10[%c0_29, %c8] : memref<16x32xf32, #tpu.memory_space<vmem>>, vector<8x8xf32>
    tpu.vector_store %arg10[%c0_29, %c8], %54 {strides = array<i32>} : memref<16x32xf32, #tpu.memory_space<vmem>>, vector<8x8xf32>,
    %56 = vector.extract_strided_slice %5 {offsets = [0, 16], sizes = [8, 8], strides = [1, 1]} : vector<16x32xf32> to vector<8x8xf32>
    %57 = vector.extract_strided_slice %11 {offsets = [0, 16], sizes = [16, 8], strides = [1, 1]} : vector<32x64xf32> to vector<16x8xf32>
    %58 = vector.extract_strided_slice %11 {offsets = [0, 48], sizes = [16, 8], strides = [1, 1]} : vector<32x64xf32> to vector<16x8xf32>
    %cst_30 = arith.constant dense<0.000000e+00> : vector<8x16xf32>
    %59 = tpu.matmul %56, %57, %cst_30 {dimension_numbers = #tpu.dot_dimension_numbers<[1], [1], [0], [0], [0, 0, 1, 0], [], []>} : vector<8x8xf32>, vector<16x8xf32>, vector<8x16xf32> -> vector<8x16xf32>
    %60 = vector.broadcast %19 : vector<1x16xf32> to vector<8x16xf32>
    %61 = arith.addf %59, %60 : vector<8x16xf32>
    %cst_31 = arith.constant dense<0xFF800000> : vector<8xf32>
    %62 = vector.multi_reduction <maximumf>, %61, %cst_31 [1] : vector<8x16xf32> to vector<8xf32>
    %63 = vector.shape_cast %62 : vector<8xf32> to vector<8x1xf32>
    %64 = vector.broadcast %63 : vector<8x1xf32> to vector<8x16xf32>
    %65 = arith.subf %61, %64 : vector<8x16xf32>
    %66 = math.exp %65 : vector<8x16xf32>
    %cst_32 = arith.constant dense<0.000000e+00> : vector<8xf32>
    %67 = vector.multi_reduction <add>, %66, %cst_32 [1] : vector<8x16xf32> to vector<8xf32>
    %68 = vector.shape_cast %67 : vector<8xf32> to vector<8x1xf32>
    %69 = tpu.reciprocal %68 {approx = true} : vector<8x1xf32> -> vector<8x1xf32>
    %70 = vector.broadcast %69 : vector<8x1xf32> to vector<8x16xf32>
    %71 = arith.mulf %66, %70 : vector<8x16xf32>
    %cst_33 = arith.constant dense<0.000000e+00> : vector<8x8xf32>
    %72 = tpu.matmul %71, %58, %cst_33 {dimension_numbers = #tpu.dot_dimension_numbers<[1], [0], [0], [1], [0, 0, 1, 1], [], []>} : vector<8x16xf32>, vector<16x8xf32>, vector<8x8xf32> -> vector<8x8xf32>
    %c0_34 = arith.constant 0 : index
    %c16 = arith.constant 16 : index
    %73 = vector.load %arg10[%c0_34, %c16] : memref<16x32xf32, #tpu.memory_space<vmem>>, vector<8x8xf32>
    tpu.vector_store %arg10[%c0_34, %c16], %72 {strides = array<i32>} : memref<16x32xf32, #tpu.memory_space<vmem>>, vector<8x8xf32>,
    %74 = vector.extract_strided_slice %5 {offsets = [0, 24], sizes = [8, 8], strides = [1, 1]} : vector<16x32xf32> to vector<8x8xf32>
    %75 = vector.extract_strided_slice %11 {offsets = [0, 24], sizes = [16, 8], strides = [1, 1]} : vector<32x64xf32> to vector<16x8xf32>
    %76 = vector.extract_strided_slice %11 {offsets = [0, 56], sizes = [16, 8], strides = [1, 1]} : vector<32x64xf32> to vector<16x8xf32>
    %cst_35 = arith.constant dense<0.000000e+00> : vector<8x16xf32>
    %77 = tpu.matmul %74, %75, %cst_35 {dimension_numbers = #tpu.dot_dimension_numbers<[1], [1], [0], [0], [0, 0, 1, 0], [], []>} : vector<8x8xf32>, vector<16x8xf32>, vector<8x16xf32> -> vector<8x16xf32>
    %78 = vector.broadcast %19 : vector<1x16xf32> to vector<8x16xf32>
    %79 = arith.addf %77, %78 : vector<8x16xf32>
    %cst_36 = arith.constant dense<0xFF800000> : vector<8xf32>
    %80 = vector.multi_reduction <maximumf>, %79, %cst_36 [1] : vector<8x16xf32> to vector<8xf32>
    %81 = vector.shape_cast %80 : vector<8xf32> to vector<8x1xf32>
    %82 = vector.broadcast %81 : vector<8x1xf32> to vector<8x16xf32>
    %83 = arith.subf %79, %82 : vector<8x16xf32>
    %84 = math.exp %83 : vector<8x16xf32>
    %cst_37 = arith.constant dense<0.000000e+00> : vector<8xf32>
    %85 = vector.multi_reduction <add>, %84, %cst_37 [1] : vector<8x16xf32> to vector<8xf32>
    %86 = vector.shape_cast %85 : vector<8xf32> to vector<8x1xf32>
    %87 = tpu.reciprocal %86 {approx = true} : vector<8x1xf32> -> vector<8x1xf32>
    %88 = vector.broadcast %87 : vector<8x1xf32> to vector<8x16xf32>
    %89 = arith.mulf %84, %88 : vector<8x16xf32>
    %cst_38 = arith.constant dense<0.000000e+00> : vector<8x8xf32>
    %90 = tpu.matmul %89, %76, %cst_38 {dimension_numbers = #tpu.dot_dimension_numbers<[1], [0], [0], [1], [0, 0, 1, 1], [], []>} : vector<8x16xf32>, vector<16x8xf32>, vector<8x8xf32> -> vector<8x8xf32>
    %c0_39 = arith.constant 0 : index
    %c24 = arith.constant 24 : index
    %91 = vector.load %arg10[%c0_39, %c24] : memref<16x32xf32, #tpu.memory_space<vmem>>, vector<8x8xf32>
    tpu.vector_store %arg10[%c0_39, %c24], %90 {strides = array<i32>} : memref<16x32xf32, #tpu.memory_space<vmem>>, vector<8x8xf32>,
    %92 = vector.extract_strided_slice %17 {offsets = [1, 0], sizes = [1, 16], strides = [1, 1]} : vector<2x16xf32> to vector<1x16xf32>
    %93 = vector.extract_strided_slice %5 {offsets = [8, 0], sizes = [8, 8], strides = [1, 1]} : vector<16x32xf32> to vector<8x8xf32>
    %94 = vector.extract_strided_slice %11 {offsets = [16, 0], sizes = [16, 8], strides = [1, 1]} : vector<32x64xf32> to vector<16x8xf32>
    %95 = vector.extract_strided_slice %11 {offsets = [16, 32], sizes = [16, 8], strides = [1, 1]} : vector<32x64xf32> to vector<16x8xf32>
    %cst_40 = arith.constant dense<0.000000e+00> : vector<8x16xf32>
    %96 = tpu.matmul %93, %94, %cst_40 {dimension_numbers = #tpu.dot_dimension_numbers<[1], [1], [0], [0], [0, 0, 1, 0], [], []>} : vector<8x8xf32>, vector<16x8xf32>, vector<8x16xf32> -> vector<8x16xf32>
    %97 = vector.broadcast %92 : vector<1x16xf32> to vector<8x16xf32>
    %98 = arith.addf %96, %97 : vector<8x16xf32>
    %cst_41 = arith.constant dense<0xFF800000> : vector<8xf32>
    %99 = vector.multi_reduction <maximumf>, %98, %cst_41 [1] : vector<8x16xf32> to vector<8xf32>
    %100 = vector.shape_cast %99 : vector<8xf32> to vector<8x1xf32>
    %101 = vector.broadcast %100 : vector<8x1xf32> to vector<8x16xf32>
    %102 = arith.subf %98, %101 : vector<8x16xf32>
    %103 = math.exp %102 : vector<8x16xf32>
    %cst_42 = arith.constant dense<0.000000e+00> : vector<8xf32>
    %104 = vector.multi_reduction <add>, %103, %cst_42 [1] : vector<8x16xf32> to vector<8xf32>
    %105 = vector.shape_cast %104 : vector<8xf32> to vector<8x1xf32>
    %106 = tpu.reciprocal %105 {approx = true} : vector<8x1xf32> -> vector<8x1xf32>
    %107 = vector.broadcast %106 : vector<8x1xf32> to vector<8x16xf32>
    %108 = arith.mulf %103, %107 : vector<8x16xf32>
    %cst_43 = arith.constant dense<0.000000e+00> : vector<8x8xf32>
    %109 = tpu.matmul %108, %95, %cst_43 {dimension_numbers = #tpu.dot_dimension_numbers<[1], [0], [0], [1], [0, 0, 1, 1], [], []>} : vector<8x16xf32>, vector<16x8xf32>, vector<8x8xf32> -> vector<8x8xf32>
    %c8_44 = arith.constant 8 : index
    %c0_45 = arith.constant 0 : index
    %110 = vector.load %arg10[%c8_44, %c0_45] : memref<16x32xf32, #tpu.memory_space<vmem>>, vector<8x8xf32>
    tpu.vector_store %arg10[%c8_44, %c0_45], %109 {strides = array<i32>} : memref<16x32xf32, #tpu.memory_space<vmem>>, vector<8x8xf32>,
    %111 = vector.extract_strided_slice %5 {offsets = [8, 8], sizes = [8, 8], strides = [1, 1]} : vector<16x32xf32> to vector<8x8xf32>
    %112 = vector.extract_strided_slice %11 {offsets = [16, 8], sizes = [16, 8], strides = [1, 1]} : vector<32x64xf32> to vector<16x8xf32>
    %113 = vector.extract_strided_slice %11 {offsets = [16, 40], sizes = [16, 8], strides = [1, 1]} : vector<32x64xf32> to vector<16x8xf32>
    %cst_46 = arith.constant dense<0.000000e+00> : vector<8x16xf32>
    %114 = tpu.matmul %111, %112, %cst_46 {dimension_numbers = #tpu.dot_dimension_numbers<[1], [1], [0], [0], [0, 0, 1, 0], [], []>} : vector<8x8xf32>, vector<16x8xf32>, vector<8x16xf32> -> vector<8x16xf32>
    %115 = vector.broadcast %92 : vector<1x16xf32> to vector<8x16xf32>
    %116 = arith.addf %114, %115 : vector<8x16xf32>
    %cst_47 = arith.constant dense<0xFF800000> : vector<8xf32>
    %117 = vector.multi_reduction <maximumf>, %116, %cst_47 [1] : vector<8x16xf32> to vector<8xf32>
    %118 = vector.shape_cast %117 : vector<8xf32> to vector<8x1xf32>
    %119 = vector.broadcast %118 : vector<8x1xf32> to vector<8x16xf32>
    %120 = arith.subf %116, %119 : vector<8x16xf32>
    %121 = math.exp %120 : vector<8x16xf32>
    %cst_48 = arith.constant dense<0.000000e+00> : vector<8xf32>
    %122 = vector.multi_reduction <add>, %121, %cst_48 [1] : vector<8x16xf32> to vector<8xf32>
    %123 = vector.shape_cast %122 : vector<8xf32> to vector<8x1xf32>
    %124 = tpu.reciprocal %123 {approx = true} : vector<8x1xf32> -> vector<8x1xf32>
    %125 = vector.broadcast %124 : vector<8x1xf32> to vector<8x16xf32>
    %126 = arith.mulf %121, %125 : vector<8x16xf32>
    %cst_49 = arith.constant dense<0.000000e+00> : vector<8x8xf32>
    %127 = tpu.matmul %126, %113, %cst_49 {dimension_numbers = #tpu.dot_dimension_numbers<[1], [0], [0], [1], [0, 0, 1, 1], [], []>} : vector<8x16xf32>, vector<16x8xf32>, vector<8x8xf32> -> vector<8x8xf32>
    %c8_50 = arith.constant 8 : index
    %c8_51 = arith.constant 8 : index
    %128 = vector.load %arg10[%c8_50, %c8_51] : memref<16x32xf32, #tpu.memory_space<vmem>>, vector<8x8xf32>
    tpu.vector_store %arg10[%c8_50, %c8_51], %127 {strides = array<i32>} : memref<16x32xf32, #tpu.memory_space<vmem>>, vector<8x8xf32>,
    %129 = vector.extract_strided_slice %5 {offsets = [8, 16], sizes = [8, 8], strides = [1, 1]} : vector<16x32xf32> to vector<8x8xf32>
    %130 = vector.extract_strided_slice %11 {offsets = [16, 16], sizes = [16, 8], strides = [1, 1]} : vector<32x64xf32> to vector<16x8xf32>
    %131 = vector.extract_strided_slice %11 {offsets = [16, 48], sizes = [16, 8], strides = [1, 1]} : vector<32x64xf32> to vector<16x8xf32>
    %cst_52 = arith.constant dense<0.000000e+00> : vector<8x16xf32>
    %132 = tpu.matmul %129, %130, %cst_52 {dimension_numbers = #tpu.dot_dimension_numbers<[1], [1], [0], [0], [0, 0, 1, 0], [], []>} : vector<8x8xf32>, vector<16x8xf32>, vector<8x16xf32> -> vector<8x16xf32>
    %133 = vector.broadcast %92 : vector<1x16xf32> to vector<8x16xf32>
    %134 = arith.addf %132, %133 : vector<8x16xf32>
    %cst_53 = arith.constant dense<0xFF800000> : vector<8xf32>
    %135 = vector.multi_reduction <maximumf>, %134, %cst_53 [1] : vector<8x16xf32> to vector<8xf32>
    %136 = vector.shape_cast %135 : vector<8xf32> to vector<8x1xf32>
    %137 = vector.broadcast %136 : vector<8x1xf32> to vector<8x16xf32>
    %138 = arith.subf %134, %137 : vector<8x16xf32>
    %139 = math.exp %138 : vector<8x16xf32>
    %cst_54 = arith.constant dense<0.000000e+00> : vector<8xf32>
    %140 = vector.multi_reduction <add>, %139, %cst_54 [1] : vector<8x16xf32> to vector<8xf32>
    %141 = vector.shape_cast %140 : vector<8xf32> to vector<8x1xf32>
    %142 = tpu.reciprocal %141 {approx = true} : vector<8x1xf32> -> vector<8x1xf32>
    %143 = vector.broadcast %142 : vector<8x1xf32> to vector<8x16xf32>
    %144 = arith.mulf %139, %143 : vector<8x16xf32>
    %cst_55 = arith.constant dense<0.000000e+00> : vector<8x8xf32>
    %145 = tpu.matmul %144, %131, %cst_55 {dimension_numbers = #tpu.dot_dimension_numbers<[1], [0], [0], [1], [0, 0, 1, 1], [], []>} : vector<8x16xf32>, vector<16x8xf32>, vector<8x8xf32> -> vector<8x8xf32>
    %c8_56 = arith.constant 8 : index
    %c16_57 = arith.constant 16 : index
    %146 = vector.load %arg10[%c8_56, %c16_57] : memref<16x32xf32, #tpu.memory_space<vmem>>, vector<8x8xf32>
    tpu.vector_store %arg10[%c8_56, %c16_57], %145 {strides = array<i32>} : memref<16x32xf32, #tpu.memory_space<vmem>>, vector<8x8xf32>,
    %147 = vector.extract_strided_slice %5 {offsets = [8, 24], sizes = [8, 8], strides = [1, 1]} : vector<16x32xf32> to vector<8x8xf32>
    %148 = vector.extract_strided_slice %11 {offsets = [16, 24], sizes = [16, 8], strides = [1, 1]} : vector<32x64xf32> to vector<16x8xf32>
    %149 = vector.extract_strided_slice %11 {offsets = [16, 56], sizes = [16, 8], strides = [1, 1]} : vector<32x64xf32> to vector<16x8xf32>
    %cst_58 = arith.constant dense<0.000000e+00> : vector<8x16xf32>
    %150 = tpu.matmul %147, %148, %cst_58 {dimension_numbers = #tpu.dot_dimension_numbers<[1], [1], [0], [0], [0, 0, 1, 0], [], []>} : vector<8x8xf32>, vector<16x8xf32>, vector<8x16xf32> -> vector<8x16xf32>
    %151 = vector.broadcast %92 : vector<1x16xf32> to vector<8x16xf32>
    %152 = arith.addf %150, %151 : vector<8x16xf32>
    %cst_59 = arith.constant dense<0xFF800000> : vector<8xf32>
    %153 = vector.multi_reduction <maximumf>, %152, %cst_59 [1] : vector<8x16xf32> to vector<8xf32>
    %154 = vector.shape_cast %153 : vector<8xf32> to vector<8x1xf32>
    %155 = vector.broadcast %154 : vector<8x1xf32> to vector<8x16xf32>
    %156 = arith.subf %152, %155 : vector<8x16xf32>
    %157 = math.exp %156 : vector<8x16xf32>
    %cst_60 = arith.constant dense<0.000000e+00> : vector<8xf32>
    %158 = vector.multi_reduction <add>, %157, %cst_60 [1] : vector<8x16xf32> to vector<8xf32>
    %159 = vector.shape_cast %158 : vector<8xf32> to vector<8x1xf32>
    %160 = tpu.reciprocal %159 {approx = true} : vector<8x1xf32> -> vector<8x1xf32>
    %161 = vector.broadcast %160 : vector<8x1xf32> to vector<8x16xf32>
    %162 = arith.mulf %157, %161 : vector<8x16xf32>
    %cst_61 = arith.constant dense<0.000000e+00> : vector<8x8xf32>
    %163 = tpu.matmul %162, %149, %cst_61 {dimension_numbers = #tpu.dot_dimension_numbers<[1], [0], [0], [1], [0, 0, 1, 1], [], []>} : vector<8x16xf32>, vector<16x8xf32>, vector<8x8xf32> -> vector<8x8xf32>
    %c8_62 = arith.constant 8 : index
    %c24_63 = arith.constant 24 : index
    %164 = vector.load %arg10[%c8_62, %c24_63] : memref<16x32xf32, #tpu.memory_space<vmem>>, vector<8x8xf32>
    tpu.vector_store %arg10[%c8_62, %c24_63], %163 {strides = array<i32>} : memref<16x32xf32, #tpu.memory_space<vmem>>, vector<8x8xf32>,
    %165 = vector.broadcast %18 : f32 to vector<16x32xf32>
    %166 = arith.mulf %165, %0 : vector<16x32xf32>
    %c0_64 = arith.constant 0 : index
    %c0_65 = arith.constant 0 : index
    %167 = vector.load %arg10[%c0_64, %c0_65] : memref<16x32xf32, #tpu.memory_space<vmem>>, vector<16x32xf32>
    %168 = arith.addf %166, %167 : vector<16x32xf32>
    %c0_66 = arith.constant 0 : index
    %c0_67 = arith.constant 0 : index
    %169 = vector.load %arg9[%c0_66, %c0_67] : memref<16x32xf32, #tpu.memory_space<vmem>>, vector<16x32xf32>
    tpu.vector_store %arg9[%c0_66, %c0_67], %168 {strides = array<i32>} : memref<16x32xf32, #tpu.memory_space<vmem>>, vector<16x32xf32>,
    return
  }
  func.func @transform_0(%arg0: i32) -> (i32, i32) {
    %c0_i32 = arith.constant 0 : i32
    %c0_i32_0 = arith.constant 0 : i32
    return %arg0, %c0_i32 : i32, i32
  }
  func.func @transform_1(%arg0: i32) -> (i32, i32) {
    %c0_i32 = arith.constant 0 : i32
    %c0_i32_0 = arith.constant 0 : i32
    return %arg0, %c0_i32 : i32, i32
  }
  func.func @transform_2(%arg0: i32) -> (i32, i32, i32) {
    %c0_i32 = arith.constant 0 : i32
    %c0_i32_0 = arith.constant 0 : i32
    %c0_i32_1 = arith.constant 0 : i32
    return %arg0, %c0_i32, %c0_i32_0 : i32, i32, i32
  }
  func.func @transform_3(%arg0: i32) -> (i32, i32) {
    %c0_i32 = arith.constant 0 : i32
    %c0_i32_0 = arith.constant 0 : i32
    %c0_i32_1 = arith.constant 0 : i32
    return %c0_i32, %c0_i32_0 : i32, i32
  }
  func.func @transform_4(%arg0: i32) -> (i32, i32) {
    %c0_i32 = arith.constant 0 : i32
    %c0_i32_0 = arith.constant 0 : i32
    %c0_i32_1 = arith.constant 0 : i32
    return %c0_i32, %c0_i32_0 : i32, i32
  }
  func.func @transform_5(%arg0: i32) -> (i32, i32) {
    %c0_i32 = arith.constant 0 : i32
    %c0_i32_0 = arith.constant 0 : i32
    %c0_i32_1 = arith.constant 0 : i32
    return %c0_i32, %c0_i32_0 : i32, i32
  }
  func.func @transform_6(%arg0: i32) -> (i32, i32) {
    %c0_i32 = arith.constant 0 : i32
    %c0_i32_0 = arith.constant 0 : i32
    %c0_i32_1 = arith.constant 0 : i32
    return %c0_i32, %c0_i32_0 : i32, i32
  }
  func.func @transform_7(%arg0: i32) -> (i32, i32) {
    %c0_i32 = arith.constant 0 : i32
    %c0_i32_0 = arith.constant 0 : i32
    %c0_i32_1 = arith.constant 0 : i32
    return %c0_i32, %c0_i32_0 : i32, i32
  }
  func.func @transform_8(%arg0: i32) -> (i32, i32) {
    %c0_i32 = arith.constant 0 : i32
    %c0_i32_0 = arith.constant 0 : i32
    return %arg0, %c0_i32 : i32, i32
  }
}

</mosaic_0001>

<bundles_post_ra>
// kernel: triples_attn_to_context.1
= control target key start
LH: loop header
LB: loop body
LE: loop exit
PB: predicated region body
PF: predicated region fallthrough
CT: control target
= control target key end

     0   :  { %vm44_vm0 = vcmask 261120   ;;  %s2384_s0 = inlined_call_operand.vmem [shape: f32[16,32], index: 0, kind: input, shape index: {}]   ;;  %s2385_s1 = inlined_call_operand.vmem [shape: f32[32,32], index: 1, kind: input, shape index: {}]   ;;  %s2386_s2 = inlined_call_operand.vmem [shape: f32[1,2,16], index: 2, kind: input, shape index: {}]   ;;  %s2387_s3 = inlined_call_operand.vmem [shape: f32[32,32], index: 3, kind: input, shape index: {}]   ;;  %s2388_s4 = inlined_call_operand.vmem [shape: f32[32,64], index: 4, kind: input, shape index: {}]   ;;  %s2389_s5 = inlined_call_operand.vmem [shape: f32[1,32], index: 5, kind: input, shape index: {}]   ;;  %s2390_s6 = inlined_call_operand.vmem [shape: f32[1,64], index: 6, kind: input, shape index: {}]   ;;  %s2391_s7 = inlined_call_operand.<no memory space> [shape: f32[1,1], index: 7, kind: input, shape index: {}]   ;;  %s2392_s8 = inlined_call_operand.hbm [shape: f32[16,32], index: 8, kind: output, shape index: {}]  }
   0x1   :  { %v133_v0 = vld [vmem:[%s2388_s4 + $0x18] sm:$0xff]  ;;  %v132_v1 = vld [vmem:[%s2388_s4 + $0x10] sm:$0xff]  ;;  %v131_v4 = vld [vmem:[%s2388_s4 + $0x8] sm:$0xff]  ;;  %v1657_v8 = vstv %s2391_s7 }
   0x2   :  { %v36_v2 = vld [vmem:[%s2387_s3 + $0x18] sm:$0xff]  ;;  %1796 = vmatprep.subr.mxu1 %v133_v0  ;;  %v35_v3 = vld [vmem:[%s2387_s3 + $0x10] sm:$0xff]  ;;  %v34_v5 = vld [vmem:[%s2387_s3 + $0x8] sm:$0xff] }
   0x3   :  { %1785 = vmatprep.subr.mxu0 %v36_v2  ;;  %1797 = vmatpush3.msra.mxu1 %v133_v0  ;;  %v126_v6 = vld [vmem:[%s2385_s1] sm:$0xff]  ;;  %v32_v7 = vld [vmem:[%s2384_s0 + $0x8] sm:$0xff] }
   0x4   :  { %1786 = vmatpush3.msra.mxu0 %v36_v2  ;;  %1798 = vmatprep.subr.mxu1 %v132_v1  ;;  %v130_v9 = vld [vmem:[%s2388_s4] sm:$0xff]  ;;  %v2083_v10 = vmul.f32 %v1657_v8, %v32_v7 }
   0x5   :  { %1787 = vmatprep.subr.mxu0 %v35_v3  ;;  %1799 = vmatpush3.msra.mxu1 %v132_v1 }
   0x6   :  { %1788 = vmatpush3.msra.mxu0 %v35_v3 }
   0x7   :  { %14 = vsyncpa [#allocation5], 0  ;;  %1800 = vmatprep.subr.mxu1 %v131_v4  ;;  %1789 = vmatprep.subr.mxu0 %v34_v5  ;;  %v33_v11 = vld [vmem:[%s2387_s3] sm:$0xff]  ;;  %v127_v12 = vld [vmem:[%s2385_s1 + $0x8] sm:$0xff]  ;;  %v1990_v14 = vmov 0.0   ;;  %vm1991_vm1 = vmmov 0   ;;  %v242_v28 = vlaneseq }
   0x8   :  { %1801 = vmatpush3.msra.mxu1 %v131_v4  ;;  %1804 = vmatprep.mubr.msk.f32.mxu1 %vm44_vm0, %v126_v6  ;;  %v2095_v13 = vld [vmem:[%s2384_s0] sm:$0xff]  ;;  %vm246_vm2 = vcmask 64512   ;;  %s1992_s12 = smov 120   ;;  %vm326_vm3 = vcmask 130048   ;;  %s1993_s13 = smov 96   ;;  %v128_v48 = vld [vmem:[%s2385_s1 + $0x10] sm:$0xff] }
   0x9   :  { %1802 = vmatprep.subr.mxu1 %v130_v9  ;;  %1790 = vmatpush3.msra.mxu0 %v34_v5  ;;  %v2108_v15 = vld [vmem:[%s2390_s6] ss:$0 sm:$0xff]  ;;  %v2149_v31 = vshrl.u32 %v242_v28, 7  ;;  %s1995_s14 = smov 112   ;;  %v129_v49 = vld [vmem:[%s2385_s1 + $0x18] sm:$0xff]  ;;  %s1996_s1 = smov 80  }
   0xa   :  { %1803 = vmatpush3.msra.mxu1 %v130_v9  ;;  %1791 = vmatprep.subr.mxu0 %v33_v11  ;;  %v1682_v17 = vld [vmem:[%s2389_s5] ss:$0 sm:$0xff]  ;;  %s1997_s19 = smov 104   ;;  %s1998_s20 = smov 72   ;;  %vm594_vm4 = vcmask 130112   ;;  %vm772_vm5 = vcmask 195712  }
   0xb   :  { %1805 = vmatmul.mubr.msk.f32.vlgmr.msra.gmra.mxu1 %vm44_vm0, %v127_v12  ;;  %1792 = vmatpush3.msra.mxu0 %v33_v11  ;;  %v238_v29 = vld [vmem:[%s2386_s2] sm:$0x3]  ;;  %v244_v33 = vsub.s32 0, %v2149_v31  ;;  %s1994_s2 = smov 88   ;;  %s1999_s21 = smov 8   ;;  %vm950_vm6 = vcmask 261312  }
   0xc   :  { %1793 = vmatprep.mubr.msk.f32.mxu0 %vm44_vm0, %v2095_v13  ;;  %1810 = vmatprep.subr.mxu0 %v1990_v14  ;;  %v1690_v30 = vadd.f32 -1.0, %v238_v29  ;;  %s2000_s22 = smov 16   ;;  %s2001_s23 = smov 24  }
   0xd   :  { %1794 = vmatmul.mubr.msk.f32.vlgmr.msra.gmra.mxu0 %vm44_vm0, %v32_v7  ;;  %1817 = vmatprep.subr.mxu1 %v1990_v14  ;;  %s2002_s7 = smov [#allocation4]  }
   0xe   :  { %1814 = vmatprep.mubr.msk.f32.mxu0 %vm1991_vm1, %v1990_v14  ;;  %v2151_v32 = vmul.f32 1e+09, %v1690_v30  ;;  %1807 = vmatprep.mubr.msk.f32.mxu1 %vm44_vm0, %v128_v48  ;;  %s1671_s26 = sshll.u32 %s2002_s7, 4  ;;  %s1672_s26 = int_to_ptr.vmem [resolvable:$true] %s1671_s26 }
   0xf   :  { %1808 = vmatmul.mubr.msk.f32.gmra.mxu1 %vm44_vm0, %v129_v49  ;;  %s1968_s27 = scalar_lea.vmem %s1672_s26, 256  ;;  %p1973_p1 = scmp.lt.s32.totalorder %s1672_s26, %s1672_s26 }
  0x10   :  { %v2155_v34 = vrot.slane %v2151_v32, %v244_v33  ;;  %1821 = vmatprep.mubr.msk.f32.mxu1 %vm1991_vm1, %v1990_v14  ;;  %p1969_p0 = scmp.ne.s32.totalorder %s1672_s26, %s1968_s27  ;;  %p1974_p2 = scmp.lt.s32.totalorder %s1968_s27, %s1968_s27 }
  0x12   :  { %p1975_p3 = por %p1974_p2, %p1973_p1 }
  0x14   :  { %p1976_p4 = pnand %p1975_p3, %p1969_p0 }
  0xcb   :  { %v1806_v16 = vpop.f32.mrf.mxu1 }
  0xcc   :  { %v2114_v18 = vadd.f32 %v1806_v16, %v2108_v15 }
  0xcd   :  { %v219_v19 = vpop.f32.mrf.mxu1  ;;  %v1795_v20 = vpop.f32.mrf.mxu0 }
  0xce   :  { %422 = vrot.lane.b32.xlu0 %v2114_v18, %s1992_s12  ;;  %v2118_v21 = vadd.f32 %v1795_v20, %v1682_v17  ;;  %1811 = vmatpush3.xpose.msk.msra.mxu0 %vm246_vm2, %v2114_v18  ;;  %v2124_v23 = vadd.f32 %v2108_v15, %v219_v19 }
  0xcf   :  { %v117_v22 = vpop.f32.mrf.mxu0  ;;  %1812 = vmatprep.subr.mxu0 %v1990_v14  ;;  %v2206_v4 = vpop.f32.mrf.mxu1 }
  0xd0   :  { %v2126_v24 = vadd.f32 %v1682_v17, %v117_v22 }
  0xd1   :  { %v2208_v5 = vpop.f32.mrf.mxu1 }
  0xd2   :  { %420 = vrot.lane.b32.xlu0 %v2124_v23, %s1992_s12  ;;  %1813 = vmatpush3.xpose.msk.msra.mxu0 %vm246_vm2, %v2124_v23 }
  0xd3   :  { %418 = vrot.lane.b32.xlu1 %v2126_v24, %s1992_s12  ;;  %1824 = vmatprep.subr.mxu0 %v1990_v14 }
  0xd5   :  { %1815 = vmatmul.mubr.msk.f32.vlgmr.msra.gmra.mxu0 %vm246_vm2, %v2126_v24 }
  0xd6   :  { %1828 = vmatprep.mubr.msk.f32.mxu0 %vm1991_vm1, %v1990_v14 }
 0x140   :  { %v423_v25 = vpop.permute.xlu0 %422 }
 0x141   :  { %1825 = vmatpush3.xpose.msk.msra.mxu0 %vm246_vm2, %v423_v25 }
 0x142   :  { %1826 = vmatprep.subr.mxu0 %v1990_v14 }
 0x144   :  { %v421_v26 = vpop.permute.xlu0 %420 }
 0x145   :  { %1827 = vmatpush3.xpose.msk.msra.mxu0 %vm246_vm2, %v421_v26  ;;  %v419_v27 = vpop.permute.xlu1 %418 }
 0x146   :  { %1845 = vmatprep.subr.mxu0 %v1990_v14 }
 0x148   :  { %1829 = vmatmul.mubr.msk.f32.vlgmr.msra.gmra.mxu0 %vm246_vm2, %v419_v27 }
 0x149   :  { %1849 = vmatprep.mubr.msk.f32.mxu0 %vm1991_vm1, %v1990_v14 }
 0x195   :  { %v322_v35 = vpop.f32.mrf.mxu0 }
 0x196   :  { %v323_v36 = vadd.f32 %v322_v35, %v2155_v34 }
 0x197   :  { %v1816_v37 = vpop.f32.mrf.mxu0 }
 0x198   :  { %v327_v38 = vsel %vm326_vm3, %v323_v36, -inf }
 0x199   :  { %328 = vmax.xlane.f32.xlu1 %v327_v38 }
 0x1aa   :  { %338 = vrot.lane.b32.xlu1 %v2124_v23, %s1993_s13 }
 0x1ae   :  { %513 = vrot.lane.b32.xlu1 %v2114_v18, %s1994_s2 }
 0x1b2   :  { %600 = vrot.lane.b32.xlu1 %v2114_v18, %s1995_s14 }
 0x208   :  { %v496_v39 = vpop.f32.mrf.mxu0 }
 0x209   :  { %v497_v40 = vadd.f32 %v496_v39, %v2155_v34 }
 0x20a   :  { %v1830_v41 = vpop.f32.mrf.mxu0 }
 0x20b   :  { %v500_v42 = vsel %vm326_vm3, %v497_v40, -inf }
 0x20c   :  { %501 = vmax.xlane.f32.xlu0 %v500_v42 }
 0x222   :  { %340 = vrot.lane.b32.xlu0 %v2114_v18, %s1993_s13  ;;  %v329_v43 = vpop.xlane.xlu1 %328 }
 0x223   :  { %v330_v44 = vsub.f32 %v323_v36, %v329_v43 }
 0x225   :  { %v331_v45 = vmul.f32 1.442695, %v330_v44 }
 0x226   :  { %v339_v54 = vpop.permute.xlu1 %338 }
 0x227   :  { %1936 = vpow2.f32 %v331_v45 }
 0x22a   :  { %v514_v60 = vpop.permute.xlu1 %513 }
 0x22e   :  { %v601_v62 = vpop.permute.xlu1 %600 }
 0x234   :  { %v1937_v46 = vpop.eup %1936 }
 0x235   :  { %v333_v47 = vsel %vm326_vm3, %v1937_v46, 0.0 }
 0x241   :  { %334 = vadd.xlane.f32.xlu0 %v333_v47 }
 0x257   :  { %511 = vrot.lane.b32.xlu0 %v2124_v23, %s1994_s2 }
 0x25b   :  { %598 = vrot.lane.b32.xlu0 %v2124_v23, %s1995_s14 }
 0x295   :  { %v502_v50 = vpop.xlane.xlu0 %501 }
 0x296   :  { %v503_v51 = vsub.f32 %v497_v40, %v502_v50 }
 0x298   :  { %v504_v52 = vmul.f32 1.442695, %v503_v51 }
 0x299   :  { %v341_v53 = vpop.permute.xlu0 %340 }
 0x29a   :  { %1938 = vpow2.f32 %v504_v52  ;;  %1818 = vmatpush3.msra.mxu1 %v341_v53  ;;  %v2249_v52 = vadd.f32 %v2206_v4, %v2108_v15 }
 0x29b   :  { %1819 = vmatprep.subr.mxu1 %v1990_v14 }
 0x29c   :  { %1820 = vmatpush3.msra.mxu1 %v339_v54  ;;  %v954_v54 = vsub.s32 1, %v2149_v31 }
 0x29d   :  { %1831 = vmatprep.subr.mxu1 %v1990_v14 }
 0x2a7   :  { %v1939_v55 = vpop.eup %1938 }
 0x2a8   :  { %v506_v56 = vsel %vm326_vm3, %v1939_v55, 0.0 }
 0x2a9   :  { %507 = vadd.xlane.f32.xlu1 %v506_v56  ;;  %v2272_v56 = vrot.slane %v2151_v32, %v954_v54 }
 0x2ba   :  { %596 = vrot.lane.b32.xlu1 %v2126_v24, %s1995_s14 }
 0x2be   :  { %689 = vrot.lane.b32.xlu1 %v2124_v23, %s1996_s1 }
 0x2ca   :  { %v335_v57 = vpop.xlane.xlu0 %334 }
 0x2cb   :  { %1940 = vrcp.f32 %v335_v57 }
 0x2ce   :  { %v512_v61 = vpop.permute.xlu0 %511 }
 0x2d2   :  { %v599_v2 = vpop.permute.xlu0 %598 }
 0x2d8   :  { %v1941_v58 = vpop.eup %1940 }
 0x2d9   :  { %v337_v59 = vmul.f32 %v1941_v58, %v1937_v46 }
 0x2db   :  { %1822 = vmatmul.mubr.msk.f32.vlgmr.msra.gmra.mxu1 %vm326_vm3, %v337_v59 }
 0x2dc   :  { %1832 = vmatpush3.msra.mxu1 %v514_v60  ;;  %1835 = vmatprep.mubr.msk.f32.mxu1 %vm1991_vm1, %v1990_v14 }
 0x2dd   :  { %1833 = vmatprep.subr.mxu1 %v1990_v14 }
 0x2de   :  { %1834 = vmatpush3.msra.mxu1 %v512_v61 }
 0x2df   :  { %1838 = vmatprep.subr.mxu1 %v1990_v14 }
 0x332   :  { %v508_v63 = vpop.xlane.xlu1 %507 }
 0x333   :  { %1942 = vrcp.f32 %v508_v63 }
 0x336   :  { %v597_v3 = vpop.permute.xlu1 %596 }
 0x33a   :  { %v690_v27 = vpop.permute.xlu1 %689 }
 0x340   :  { %v1943_v0 = vpop.eup %1942 }
 0x341   :  { %v510_v1 = vmul.f32 %v1943_v0, %v1939_v55 }
 0x343   :  { %1836 = vmatmul.mubr.msk.f32.vlgmr.msra.gmra.mxu1 %vm326_vm3, %v510_v1 }
 0x344   :  { %1839 = vmatpush3.xpose.msk.msra.mxu1 %vm246_vm2, %v601_v62  ;;  %1842 = vmatprep.mubr.msk.f32.mxu1 %vm1991_vm1, %v1990_v14 }
 0x345   :  { %1840 = vmatprep.subr.mxu1 %v1990_v14 }
 0x348   :  { %1841 = vmatpush3.xpose.msk.msra.mxu1 %vm246_vm2, %v599_v2 }
 0x349   :  { %1859 = vmatprep.subr.mxu1 %v1990_v14 }
 0x34b   :  { %1843 = vmatmul.mubr.msk.f32.vlgmr.msra.gmra.mxu1 %vm246_vm2, %v597_v3 }
 0x34c   :  { %1863 = vmatprep.mubr.msk.f32.mxu1 %vm1991_vm1, %v1990_v14 }
 0x39b   :  { %v413_v6 = vpop.f32.mrf.mxu1 }
 0x39c   :  { %417 = vst.msk [vmem:[#allocation2] sm:$0xff] %vm246_vm2, %v413_v6 }
 0x39d   :  { %v1823_v7 = vpop.f32.mrf.mxu1 }
 0x403   :  { %v2211_v9 = vpop.f32.mrf.mxu1 }
 0x405   :  { %v1837_v11 = vpop.f32.mrf.mxu1 }
 0x40b   :  { %v674_v12 = vpop.f32.mrf.mxu1 }
 0x40c   :  { %v675_v16 = vadd.f32 %v674_v12, %v2155_v34 }
 0x40d   :  { %v1844_v17 = vpop.f32.mrf.mxu1 }
 0x40e   :  { %v678_v19 = vsel %vm326_vm3, %v675_v16, -inf }
 0x40f   :  { %679 = vmax.xlane.f32.xlu0 %v678_v19 }
 0x425   :  { %691 = vrot.lane.b32.xlu0 %v2114_v18, %s1996_s1 }
 0x429   :  { %778 = vrot.lane.b32.xlu0 %v2114_v18, %s1997_s19 }
 0x42d   :  { %774 = vrot.lane.b32.xlu0 %v2126_v24, %s1997_s19 }
 0x498   :  { %v680_v20 = vpop.xlane.xlu0 %679 }
 0x499   :  { %v681_v22 = vsub.f32 %v675_v16, %v680_v20 }
 0x49b   :  { %v682_v25 = vmul.f32 1.442695, %v681_v22 }
 0x49c   :  { %v692_v26 = vpop.permute.xlu0 %691 }
 0x49d   :  { %1944 = vpow2.f32 %v682_v25  ;;  %1846 = vmatpush3.msra.mxu0 %v692_v26 }
 0x49e   :  { %1847 = vmatprep.subr.mxu0 %v1990_v14 }
 0x49f   :  { %1848 = vmatpush3.msra.mxu0 %v690_v27 }
 0x4a0   :  { %1852 = vmatprep.subr.mxu0 %v1990_v14  ;;  %v779_v35 = vpop.permute.xlu0 %778 }
 0x4a4   :  { %v775_v37 = vpop.permute.xlu0 %774 }
 0x4aa   :  { %v1945_v28 = vpop.eup %1944 }
 0x4ab   :  { %v684_v29 = vsel %vm326_vm3, %v1945_v28, 0.0 }
 0x4ac   :  { %685 = vadd.xlane.f32.xlu1 %v684_v29 }
 0x4bd   :  { %776 = vrot.lane.b32.xlu1 %v2124_v23, %s1997_s19 }
 0x535   :  { %v686_v24 = vpop.xlane.xlu1 %685 }
 0x536   :  { %1946 = vrcp.f32 %v686_v24 }
 0x539   :  { %v777_v36 = vpop.permute.xlu1 %776 }
 0x543   :  { %v1947_v30 = vpop.eup %1946 }
 0x544   :  { %v688_v33 = vmul.f32 %v1947_v30, %v1945_v28 }
 0x546   :  { %1850 = vmatmul.mubr.msk.f32.vlgmr.msra.gmra.mxu0 %vm326_vm3, %v688_v33 }
 0x547   :  { %1853 = vmatpush3.xpose.msk.msra.mxu0 %vm246_vm2, %v779_v35  ;;  %1856 = vmatprep.mubr.msk.f32.mxu0 %vm1991_vm1, %v1990_v14 }
 0x548   :  { %1854 = vmatprep.subr.mxu0 %v1990_v14 }
 0x54b   :  { %1855 = vmatpush3.xpose.msk.msra.mxu0 %vm246_vm2, %v777_v36 }
 0x54c   :  { %1873 = vmatprep.subr.mxu0 %v1990_v14 }
 0x54e   :  { %1857 = vmatmul.mubr.msk.f32.vlgmr.msra.gmra.mxu0 %vm246_vm2, %v775_v37 }
 0x54f   :  { %1877 = vmatprep.mubr.msk.f32.mxu0 %vm1991_vm1, %v1990_v14 }
 0x606   :  { %v2236_v38 = vpop.f32.mrf.mxu0 }
 0x608   :  { %v1851_v39 = vpop.f32.mrf.mxu0 }
 0x60e   :  { %v852_v40 = vpop.f32.mrf.mxu0 }
 0x60f   :  { %v853_v41 = vadd.f32 %v852_v40, %v2155_v34 }
 0x610   :  { %v1858_v42 = vpop.f32.mrf.mxu0 }
 0x611   :  { %v856_v43 = vsel %vm326_vm3, %v853_v41, -inf }
 0x612   :  { %857 = vmax.xlane.f32.xlu1 %v856_v43 }
 0x623   :  { %867 = vrot.lane.b32.xlu1 %v2124_v23, %s1998_s20 }
 0x69b   :  { %v858_v44 = vpop.xlane.xlu1 %857 }
 0x69c   :  { %v859_v45 = vsub.f32 %v853_v41, %v858_v44 }
 0x69e   :  { %v860_v46 = vmul.f32 1.442695, %v859_v45 }
 0x69f   :  { %v868_v50 = vpop.permute.xlu1 %867 }
 0x6a0   :  { %1948 = vpow2.f32 %v860_v46 }
 0x6ad   :  { %v1949_v47 = vpop.eup %1948 }
 0x6ae   :  { %v862_v48 = vsel %vm326_vm3, %v1949_v47, 0.0 }
 0x6af   :  { %863 = vadd.xlane.f32.xlu0 %v862_v48 }
 0x6c5   :  { %869 = vrot.lane.b32.xlu0 %v2114_v18, %s1998_s20  ;;  %v2259_v18 = vadd.f32 %v2108_v15, %v2208_v5 }
 0x738   :  { %v864_v34 = vpop.xlane.xlu0 %863 }
 0x739   :  { %1950 = vrcp.f32 %v864_v34 }
 0x73c   :  { %v870_v49 = vpop.permute.xlu0 %869 }
 0x73d   :  { %1860 = vmatpush3.msra.mxu1 %v870_v49 }
 0x73e   :  { %1861 = vmatprep.subr.mxu1 %v1990_v14 }
 0x73f   :  { %1862 = vmatpush3.msra.mxu1 %v868_v50 }
 0x740   :  { %1866 = vmatprep.subr.mxu1 %v1990_v14 }
 0x746   :  { %v1951_v23 = vpop.eup %1950 }
 0x747   :  { %v866_v51 = vmul.f32 %v1951_v23, %v1949_v47 }
 0x749   :  { %1864 = vmatmul.mubr.msk.f32.vlgmr.msra.gmra.mxu1 %vm326_vm3, %v866_v51 }
 0x74a   :  { %1867 = vmatpush3.xpose.msk.msra.mxu1 %vm246_vm2, %v2249_v52  ;;  %1870 = vmatprep.mubr.msk.f32.mxu1 %vm1991_vm1, %v1990_v14 }
 0x74b   :  { %1868 = vmatprep.subr.mxu1 %v1990_v14 }
 0x74e   :  { %1869 = vmatpush3.xpose.msk.msra.mxu1 %vm246_vm2, %v2259_v18 }
 0x74f   :  { %1887 = vmatprep.subr.mxu1 %v1990_v14 }
 0x751   :  { %1871 = vmatmul.mubr.msk.f32.vlgmr.msra.gmra.mxu1 %vm246_vm2, %v2118_v21 }
 0x752   :  { %1891 = vmatprep.mubr.msk.f32.mxu1 %vm1991_vm1, %v1990_v14 }
 0x809   :  { %v2268_v53 = vpop.f32.mrf.mxu1 }
 0x80b   :  { %v1865_v55 = vpop.f32.mrf.mxu1 }
 0x811   :  { %v1031_v15 = vpop.f32.mrf.mxu1 }
 0x812   :  { %v1032_v57 = vadd.f32 %v1031_v15, %v2272_v56 }
 0x813   :  { %v1872_v58 = vpop.f32.mrf.mxu1 }
 0x814   :  { %v1035_v59 = vsel %vm326_vm3, %v1032_v57, -inf }
 0x815   :  { %1036 = vmax.xlane.f32.xlu1 %v1035_v59 }
 0x826   :  { %1046 = vrot.lane.b32.xlu1 %v2259_v18, %s1993_s13 }
 0x82a   :  { %1130 = vrot.lane.b32.xlu1 %v2249_v52, %s1992_s12 }
 0x82e   :  { %1126 = vrot.lane.b32.xlu1 %v2118_v21, %s1992_s12 }
 0x832   :  { %1219 = vrot.lane.b32.xlu1 %v2259_v18, %s1994_s2 }
 0x89e   :  { %v1037_v31 = vpop.xlane.xlu1 %1036 }
 0x89f   :  { %v1038_v32 = vsub.f32 %v1032_v57, %v1037_v31 }
 0x8a1   :  { %v1039_v60 = vmul.f32 1.442695, %v1038_v32 }
 0x8a2   :  { %v1047_v1 = vpop.permute.xlu1 %1046 }
 0x8a3   :  { %1952 = vpow2.f32 %v1039_v60 }
 0x8a6   :  { %v1131_v4 = vpop.permute.xlu1 %1130 }
 0x8aa   :  { %v1127_v6 = vpop.permute.xlu1 %1126 }
 0x8ae   :  { %v1220_v27 = vpop.permute.xlu1 %1219 }
 0x8b0   :  { %v1953_v61 = vpop.eup %1952 }
 0x8b1   :  { %v1041_v62 = vsel %vm326_vm3, %v1953_v61, 0.0 }
 0x8b2   :  { %1042 = vadd.xlane.f32.xlu0 %v1041_v62 }
 0x8c8   :  { %1048 = vrot.lane.b32.xlu0 %v2249_v52, %s1993_s13 }
 0x8cc   :  { %1128 = vrot.lane.b32.xlu0 %v2259_v18, %s1992_s12 }
 0x93b   :  { %v1043_v63 = vpop.xlane.xlu0 %1042 }
 0x93c   :  { %1954 = vrcp.f32 %v1043_v63 }
 0x93f   :  { %v1049_v0 = vpop.permute.xlu0 %1048 }
 0x940   :  { %1874 = vmatpush3.msra.mxu0 %v1049_v0 }
 0x941   :  { %1875 = vmatprep.subr.mxu0 %v1990_v14 }
 0x942   :  { %1876 = vmatpush3.msra.mxu0 %v1047_v1 }
 0x943   :  { %1880 = vmatprep.subr.mxu0 %v1990_v14  ;;  %v1129_v5 = vpop.permute.xlu0 %1128 }
 0x949   :  { %v1955_v2 = vpop.eup %1954 }
 0x94a   :  { %v1045_v3 = vmul.f32 %v1955_v2, %v1953_v61 }
 0x94c   :  { %1878 = vmatmul.mubr.msk.f32.vlgmr.msra.gmra.mxu0 %vm326_vm3, %v1045_v3 }
 0x94d   :  { %1881 = vmatpush3.xpose.msk.msra.mxu0 %vm246_vm2, %v1131_v4  ;;  %1884 = vmatprep.mubr.msk.f32.mxu0 %vm1991_vm1, %v1990_v14 }
 0x94e   :  { %1882 = vmatprep.subr.mxu0 %v1990_v14 }
 0x951   :  { %1883 = vmatpush3.xpose.msk.msra.mxu0 %vm246_vm2, %v1129_v5 }
 0x952   :  { %1901 = vmatprep.subr.mxu0 %v1990_v14 }
 0x954   :  { %1885 = vmatmul.mubr.msk.f32.vlgmr.msra.gmra.mxu0 %vm246_vm2, %v1127_v6 }
 0x955   :  { %1905 = vmatprep.mubr.msk.f32.mxu0 %vm1991_vm1, %v1990_v14 }
 0xa0c   :  { %v1121_v7 = vpop.f32.mrf.mxu0 }
 0xa0d   :  { %1125 = vst.msk [vmem:[#allocation2 + $0x8] sm:$0xff] %vm246_vm2, %v1121_v7 }
 0xa0e   :  { %v1879_v11 = vpop.f32.mrf.mxu0 }
 0xa14   :  { %v1204_v12 = vpop.f32.mrf.mxu0 }
 0xa15   :  { %v1205_v16 = vadd.f32 %v1204_v12, %v2272_v56 }
 0xa16   :  { %v1886_v17 = vpop.f32.mrf.mxu0 }
 0xa17   :  { %v1208_v19 = vsel %vm326_vm3, %v1205_v16, -inf }
 0xa18   :  { %1209 = vmax.xlane.f32.xlu0 %v1208_v19 }
 0xa2e   :  { %1221 = vrot.lane.b32.xlu0 %v2249_v52, %s1994_s2 }
 0xa32   :  { %1307 = vrot.lane.b32.xlu0 %v2249_v52, %s1995_s14 }
 0xa36   :  { %1303 = vrot.lane.b32.xlu0 %v2118_v21, %s1995_s14 }
 0xaa1   :  { %v1210_v20 = vpop.xlane.xlu0 %1209 }
 0xaa2   :  { %v1211_v22 = vsub.f32 %v1205_v16, %v1210_v20 }
 0xaa4   :  { %v1212_v25 = vmul.f32 1.442695, %v1211_v22 }
 0xaa5   :  { %v1222_v26 = vpop.permute.xlu0 %1221 }
 0xaa6   :  { %1956 = vpow2.f32 %v1212_v25  ;;  %1888 = vmatpush3.msra.mxu1 %v1222_v26 }
 0xaa7   :  { %1889 = vmatprep.subr.mxu1 %v1990_v14 }
 0xaa8   :  { %1890 = vmatpush3.msra.mxu1 %v1220_v27 }
 0xaa9   :  { %1894 = vmatprep.subr.mxu1 %v1990_v14  ;;  %v1308_v35 = vpop.permute.xlu0 %1307 }
 0xaad   :  { %v1304_v37 = vpop.permute.xlu0 %1303 }
 0xab3   :  { %v1957_v28 = vpop.eup %1956 }
 0xab4   :  { %v1214_v29 = vsel %vm326_vm3, %v1957_v28, 0.0 }
 0xab5   :  { %1215 = vadd.xlane.f32.xlu1 %v1214_v29 }
 0xac6   :  { %1305 = vrot.lane.b32.xlu1 %v2259_v18, %s1995_s14 }
 0xb3e   :  { %v1216_v24 = vpop.xlane.xlu1 %1215 }
 0xb3f   :  { %1958 = vrcp.f32 %v1216_v24 }
 0xb42   :  { %v1306_v36 = vpop.permute.xlu1 %1305 }
 0xb4c   :  { %v1959_v30 = vpop.eup %1958 }
 0xb4d   :  { %v1218_v33 = vmul.f32 %v1959_v30, %v1957_v28 }
 0xb4f   :  { %1892 = vmatmul.mubr.msk.f32.vlgmr.msra.gmra.mxu1 %vm326_vm3, %v1218_v33 }
 0xb50   :  { %1895 = vmatpush3.xpose.msk.msra.mxu1 %vm246_vm2, %v1308_v35  ;;  %1898 = vmatprep.mubr.msk.f32.mxu1 %vm1991_vm1, %v1990_v14 }
 0xb51   :  { %1896 = vmatprep.subr.mxu1 %v1990_v14 }
 0xb54   :  { %1897 = vmatpush3.xpose.msk.msra.mxu1 %vm246_vm2, %v1306_v36 }
 0xb55   :  { %1915 = vmatprep.subr.mxu1 %v1990_v14 }
 0xb57   :  { %1899 = vmatmul.mubr.msk.f32.vlgmr.msra.gmra.mxu1 %vm246_vm2, %v1304_v37 }
 0xb58   :  { %1919 = vmatprep.mubr.msk.f32.mxu1 %vm1991_vm1, %v1990_v14 }
 0xc0f   :  { %v2325_v39 = vpop.f32.mrf.mxu1 }
 0xc11   :  { %v1893_v40 = vpop.f32.mrf.mxu1 }
 0xc17   :  { %v1381_v41 = vpop.f32.mrf.mxu1 }
 0xc18   :  { %v1382_v42 = vadd.f32 %v1381_v41, %v2272_v56 }
 0xc19   :  { %v1900_v43 = vpop.f32.mrf.mxu1 }
 0xc1a   :  { %v1385_v44 = vsel %vm326_vm3, %v1382_v42, -inf }
 0xc1b   :  { %1386 = vmax.xlane.f32.xlu1 %v1385_v44 }
 0xc2c   :  { %1396 = vrot.lane.b32.xlu1 %v2259_v18, %s1996_s1 }
 0xc30   :  { %1484 = vrot.lane.b32.xlu1 %v2249_v52, %s1997_s19 }
 0xc34   :  { %1480 = vrot.lane.b32.xlu1 %v2118_v21, %s1997_s19 }
 0xca4   :  { %v1387_v45 = vpop.xlane.xlu1 %1386 }
 0xca5   :  { %v1388_v46 = vsub.f32 %v1382_v42, %v1387_v45 }
 0xca7   :  { %v1389_v47 = vmul.f32 1.442695, %v1388_v46 }
 0xca8   :  { %v1397_v23 = vpop.permute.xlu1 %1396 }
 0xca9   :  { %1960 = vpow2.f32 %v1389_v47 }
 0xcac   :  { %v1485_v54 = vpop.permute.xlu1 %1484 }
 0xcb0   :  { %v1481_v15 = vpop.permute.xlu1 %1480 }
 0xcb6   :  { %v1961_v48 = vpop.eup %1960 }
 0xcb7   :  { %v1391_v34 = vsel %vm326_vm3, %v1961_v48, 0.0 }
 0xcb8   :  { %1392 = vadd.xlane.f32.xlu0 %v1391_v34 }
 0xcce   :  { %1398 = vrot.lane.b32.xlu0 %v2249_v52, %s1996_s1 }
 0xcd2   :  { %1482 = vrot.lane.b32.xlu0 %v2259_v18, %s1997_s19 }
 0xd41   :  { %v1393_v49 = vpop.xlane.xlu0 %1392 }
 0xd42   :  { %1962 = vrcp.f32 %v1393_v49 }
 0xd45   :  { %v1399_v50 = vpop.permute.xlu0 %1398 }
 0xd46   :  { %1902 = vmatpush3.msra.mxu0 %v1399_v50 }
 0xd47   :  { %1903 = vmatprep.subr.mxu0 %v1990_v14 }
 0xd48   :  { %1904 = vmatpush3.msra.mxu0 %v1397_v23 }
 0xd49   :  { %1908 = vmatprep.subr.mxu0 %v1990_v14  ;;  %v1483_v55 = vpop.permute.xlu0 %1482 }
 0xd4f   :  { %v1963_v21 = vpop.eup %1962 }
 0xd50   :  { %v1395_v51 = vmul.f32 %v1963_v21, %v1961_v48 }
 0xd52   :  { %1906 = vmatmul.mubr.msk.f32.vlgmr.msra.gmra.mxu0 %vm326_vm3, %v1395_v51 }
 0xd53   :  { %1909 = vmatpush3.xpose.msk.msra.mxu0 %vm246_vm2, %v1485_v54  ;;  %1912 = vmatprep.mubr.msk.f32.mxu0 %vm1991_vm1, %v1990_v14 }
 0xd54   :  { %1910 = vmatprep.subr.mxu0 %v1990_v14 }
 0xd57   :  { %1911 = vmatpush3.xpose.msk.msra.mxu0 %vm246_vm2, %v1483_v55 }
 0xd5a   :  { %1913 = vmatmul.mubr.msk.f32.vlgmr.msra.gmra.mxu0 %vm246_vm2, %v1481_v15 }
 0xe12   :  { %v1471_v57 = vpop.f32.mrf.mxu0 }
 0xe14   :  { %v1907_v58 = vpop.f32.mrf.mxu0 }
 0xe1a   :  { %v1558_v59 = vpop.f32.mrf.mxu0 }
 0xe1b   :  { %v1559_v31 = vadd.f32 %v1558_v59, %v2272_v56 }
 0xe1c   :  { %v1914_v32 = vpop.f32.mrf.mxu0 }
 0xe1d   :  { %v1562_v60 = vsel %vm326_vm3, %v1559_v31, -inf }
 0xe1e   :  { %1563 = vmax.xlane.f32.xlu0 %v1562_v60 }
 0xe34   :  { %1575 = vrot.lane.b32.xlu0 %v2249_v52, %s1998_s20 }
 0xe38   :  { %591 = vrot.lane.b32.xlu0 %v2211_v9, %s1999_s21 }
 0xe3c   :  { %769 = vrot.lane.b32.xlu0 %v2236_v38, %s2000_s22 }
 0xe40   :  { %947 = vrot.lane.b32.xlu0 %v2268_v53, %s2001_s23 }
 0xea7   :  { %v1564_v61 = vpop.xlane.xlu0 %1563 }
 0xea8   :  { %v1565_v56 = vsub.f32 %v1559_v31, %v1564_v61 }
 0xeaa   :  { %v1566_v62 = vmul.f32 1.442695, %v1565_v56 }
 0xeab   :  { %v1576_v63 = vpop.permute.xlu0 %1575 }
 0xeac   :  { %1964 = vpow2.f32 %v1566_v62  ;;  %1916 = vmatpush3.msra.mxu1 %v1576_v63 }
 0xead   :  { %1917 = vmatprep.subr.mxu1 %v1990_v14  ;;  %v1658_v14 = vmul.f32 %v1657_v8, %v2095_v13 }
 0xeaf   :  { %v592_v52 = vpop.permute.xlu0 %591 }
 0xeb0   :  { %595 = vst.msk [vmem:[#allocation2] sm:$0xff] %vm594_vm4, %v592_v52 }
 0xeb3   :  { %v770_v9 = vpop.permute.xlu0 %769 }
 0xeb4   :  { %773 = vst.msk [vmem:[#allocation2] sm:$0xff] %vm772_vm5, %v770_v9 }
 0xeb7   :  { %v948_v38 = vpop.permute.xlu0 %947 }
 0xeb8   :  { %951 = vst.msk [vmem:[#allocation2] sm:$0xff] %vm950_vm6, %v948_v38 }
 0xeb9   :  { %v1965_v53 = vpop.eup %1964 }
 0xeba   :  { %v1568_v0 = vsel %vm326_vm3, %v1965_v53, 0.0 }
 0xebb   :  { %1569 = vadd.xlane.f32.xlu1 %v1568_v0 }
 0xebf   :  { %v1660_v1 = vld [vmem:[#allocation2] sm:$0xff] }
 0xec0   :  { %v1662_v2 = vadd.f32 %v1660_v1, %v1658_v14 }
 0xec2   :  { %1664 = vst.msk [vmem:[#allocation4] sm:$0xff] %vm44_vm0, %v1662_v2 }
 0xecc   :  { %1573 = vrot.lane.b32.xlu1 %v2259_v18, %s1998_s20 }
 0xed0   :  { %1299 = vrot.lane.b32.xlu1 %v2325_v39, %s1999_s21 }
 0xed4   :  { %1476 = vrot.lane.b32.xlu1 %v1471_v57, %s2000_s22 }
 0xf44   :  { %v1570_v3 = vpop.xlane.xlu1 %1569 }
 0xf45   :  { %1966 = vrcp.f32 %v1570_v3 }
 0xf48   :  { %v1574_v4 = vpop.permute.xlu1 %1573 }
 0xf49   :  { %1918 = vmatpush3.msra.mxu1 %v1574_v4 }
 0xf4c   :  { %v1300_v5 = vpop.permute.xlu1 %1299 }
 0xf4d   :  { %1302 = vst.msk [vmem:[#allocation2 + $0x8] sm:$0xff] %vm594_vm4, %v1300_v5 }
 0xf50   :  { %v1477_v6 = vpop.permute.xlu1 %1476 }
 0xf51   :  { %1479 = vst.msk [vmem:[#allocation2 + $0x8] sm:$0xff] %vm772_vm5, %v1477_v6 }
 0xf52   :  { %v1967_v8 = vpop.eup %1966 }
 0xf53   :  { %v1572_v13 = vmul.f32 %v1967_v8, %v1965_v53 }
 0xf55   :  { %1920 = vmatmul.mubr.msk.f32.vlgmr.msra.gmra.mxu1 %vm326_vm3, %v1572_v13 }
0x1015   :  { %v1648_v7 = vpop.f32.mrf.mxu1 }
0x1016   :  { %1653 = vrot.lane.b32.xlu1 %v1648_v7, %s2001_s23 }
0x1017   :  { %v1921_v18 = vpop.f32.mrf.mxu1 }
0x1088   :  { %v1654_v11 = vpop.permute.xlu1 %1653 }
0x1089   :  { %1656 = vst.msk [vmem:[#allocation2 + $0x8] sm:$0xff] %vm950_vm6, %v1654_v11 }
0x1090   :  { %v1661_v12 = vld [vmem:[#allocation2 + $0x8] sm:$0xff] }
0x1091   :  { %v1663_v16 = vadd.f32 %v1661_v12, %v2083_v10 }
0x1093   :  { %1665 = vst.msk [vmem:[#allocation4 + $0x8] sm:$0xff] %vm44_vm0, %v1663_v16 }
0x1094   :  { %1979 = shalt.err (!%p1976_p4)
}
0x1095   :  { %s2003_s28 = smov 128  }
0x1096   :  { %1677 = dma.vmem_to_hbm [thread:$0]  %s1672_s26, 256, %s2392_s8, [#allocation5], %s2003_s28, %s2003_s28, %s1999_s21  }
0x1097   :  { %1988 = dma.done.wait [#allocation5], 256  }
0x1098   :  { %1989 = vsyncadd [#allocation5], 4294967040 }
0x1099   :  { %1681 = vsyncpa [#allocation5], 1 }

</bundles_post_ra>
